<compile_context>
chip_gen: v7x
topology: tpu7x:2x2x1
jax: 0.10.0
libtpu: 0.0.40
codegen_flags: <defaults>
</compile_context>

<pallas_src>
import functools

import jax
import jax.numpy as jnp
from jax import lax
from jax.experimental import pallas as pl
from jax.experimental.pallas import tpu as pltpu

K = 7      # conv kernel size
PAD = 3    # conv padding


def _largest_divisor_leq(n, cap):
    cap = max(1, min(n, cap))
    for d in range(cap, 0, -1):
        if n % d == 0:
            return d
    return 1


def _vmem_budget():
    """(per-block budget bytes, scoped vmem limit bytes) from the detected chip.

    128 MiB parts (v5e/v6e) get fatter blocks / a 64 MiB scoped limit; 64 MiB
    parts (v7x) and unknown chips keep conservative 4 MiB / 32 MiB settings.
    """
    try:
        cap = int(pltpu.get_tpu_info().vmem_capacity_bytes)
    except Exception:           # detection unavailable -> be conservative
        cap = 64 * 1024 * 1024
    limit = min(cap // 2, 64 * 1024 * 1024)
    block_budget = max(4 * 1024 * 1024, limit // 8)
    return block_budget, limit


def _pick_tiles(n, c, hw, itemsize, block_budget):
    """Pick (B_TILE, C_TILE, CH_CHUNK) for the pooling pass."""
    sub = max(8, 32 // itemsize)      # packed sublane group: f32->8, bf16->16, i8->32
    row_bytes = hw * itemsize

    # Batch tile: fat blocks amortize ~0.35us/grid-step; cross-core parallelism
    # on v7x comes from the HW axis, so no forced >=2 batch steps here.
    b_cap = max(1, block_budget // max(1, sub * row_bytes))
    b_tile = _largest_divisor_leq(n, min(n, 8, b_cap))

    # Channel tile: largest sublane-group-aligned divisor of C under budget
    # (2nd-minor block dim must be a multiple of 8 or the full axis).
    c_cap = max(1, block_budget // max(1, b_tile * row_bytes))
    if c <= c_cap:
        c_tile = c
    elif c % sub == 0:
        c_tile = sub * _largest_divisor_leq(c // sub, max(1, c_cap // sub))
    else:
        # C over budget and not sublane-aligned: the full axis is always a legal
        # block; shrink the batch tile so a double-buffered block still fits
        # the (v7x-sized) budget instead of blowing past vmem_limit_bytes.
        c_tile = c
        while b_tile > 1 and 2 * b_tile * c * row_bytes > block_budget:
            b_tile = _largest_divisor_leq(n, b_tile - 1)

    ch_chunk = _largest_divisor_leq(c_tile, sub)   # in-kernel sub-chunk
    return b_tile, c_tile, ch_chunk


def _pick_hw_tile(hw, batch_steps):
    """Split HW (lane-dense, multiple-of-128 chunks) only when the batch axis
    gives a single grid step, so both TensorCores get work on v7x."""
    if batch_steps >= 2 or hw < 256 or hw % 128 != 0:
        return hw
    cap = (hw // 2) // 128
    if cap < 1:
        return hw
    return 128 * _largest_divisor_leq(hw // 128, cap)


def _pool_kernel(x_ref, o_ref, sum_ref, max_ref, *, inv_c, ch_chunk):
    """Channel mean + max over a lane-dense (B, C_TILE, HW_TILE) block.

    x_ref:   (B, C_TILE, HW_TILE) VMEM      o_ref: (B, 2, HW_TILE) VMEM
    sum_ref, max_ref: (B, ch_chunk, HW_TILE) f32 VMEM accumulators that live
    across the (innermost, "arbitrary") C grid axis.  The streaming loop is
    pure elementwise VALU work; the cross-sublane reduce runs once, at flush.
    """
    c_step = pl.program_id(2)

    @pl.when(c_step == 0)
    def _init():
        sum_ref[...] = jnp.zeros_like(sum_ref)
        max_ref[...] = jnp.full_like(max_ref, -jnp.inf)

    c_tile = x_ref.shape[1]
    n_chunks = c_tile // ch_chunk          # exact by construction

    def _accum(xi):                        # xi: (B, ch_chunk, HW_TILE) f32
        sum_ref[...] = sum_ref[...] + xi
        max_ref[...] = jnp.maximum(max_ref[...], xi)

    if n_chunks == 1:
        _accum(x_ref[...].astype(jnp.float32))
    else:
        def body(i, carry):
            off = pl.multiple_of(i * ch_chunk, ch_chunk)
            _accum(x_ref[:, pl.ds(off, ch_chunk), :].astype(jnp.float32))
            return carry
        lax.fori_loop(0, n_chunks, body, 0)

    @pl.when(c_step == pl.num_programs(2) - 1)
    def _flush():
        o_ref[:, 0, :] = (jnp.sum(sum_ref[...], axis=1) * inv_c).astype(o_ref.dtype)
        o_ref[:, 1, :] = jnp.max(max_ref[...], axis=1).astype(o_ref.dtype)


def _conv_sigmoid_kernel(f_ref, w_ref, o_ref, pad_ref, *, b_tile):
    """7x7, 2->1 channel conv (no bias) + sigmoid on (H, W) maps.

    f_ref:   (b_tile, 2, H, W) VMEM     (channel 0 = mean, 1 = max)
    w_ref:   (2*K*K,) f32 SMEM          (flattened OIHW weight, order [c, ki, kj])
    o_ref:   (b_tile, 1, H, W) VMEM
    pad_ref: (2, H+2*PAD, W+2*PAD) f32 VMEM scratch
    """
    H = f_ref.shape[2]
    W = f_ref.shape[3]
    Hp = H + 2 * PAD
    Wp = W + 2 * PAD

    # Zero only the 3-wide border; the interior is fully overwritten per image.
    pad_ref[:, :PAD, :] = jnp.zeros((2, PAD, Wp), jnp.float32)
    pad_ref[:, PAD + H:, :] = jnp.zeros((2, PAD, Wp), jnp.float32)
    pad_ref[:, :, :PAD] = jnp.zeros((2, Hp, PAD), jnp.float32)
    pad_ref[:, :, PAD + W:] = jnp.zeros((2, Hp, PAD), jnp.float32)

    # Hoist the 98 scalar weight loads (and their scalar->vreg broadcasts) out
    # of the per-image loop; JAX does not CSE them across iterations.
    wvals = [w_ref[i] for i in range(2 * K * K)]

    def body(b, carry):
        fb = f_ref[b].astype(jnp.float32)                  # (2, H, W)
        pad_ref[:, PAD:PAD + H, PAD:PAD + W] = fb

        acc = jnp.zeros((H, W), jnp.float32)
        for c in range(2):
            for ki in range(K):
                for kj in range(K):
                    wv = wvals[c * K * K + ki * K + kj]
                    acc = acc + wv * pad_ref[c, ki:ki + H, kj:kj + W]
        o_ref[b] = jax.nn.sigmoid(acc)[None].astype(o_ref.dtype)
        return carry

    lax.fori_loop(0, b_tile, body, 0)


def spatial_attention(x, w):
    """x: (N, C, H, W), w: (1, 2, K, K) (PyTorch OIHW conv weight, no bias)."""
    N, C, H, W = x.shape
    HW = H * W
    assert w.shape == (1, 2, K, K), w.shape
    w_flat = w.reshape(-1).astype(jnp.float32)

    block_budget, vmem_limit = _vmem_budget()
    b_tile, c_tile, ch_chunk = _pick_tiles(N, C, HW, x.dtype.itemsize, block_budget)
    hw_tile = _pick_hw_tile(HW, N // b_tile)

    # Pooled intermediate in x.dtype (floating) to shrink the round-trip.
    pool_dtype = x.dtype if jnp.issubdtype(x.dtype, jnp.floating) else jnp.float32

    # ---- Pass 1: lane-dense channel pooling (mean + max), C-tiled ----------
    x3 = x.reshape(N, C, HW)            # free: contiguous reshape in HBM
    pooled = pl.pallas_call(
        functools.partial(_pool_kernel, inv_c=1.0 / C, ch_chunk=ch_chunk),
        out_shape=jax.ShapeDtypeStruct((N, 2, HW), pool_dtype),
        grid=(N // b_tile, HW // hw_tile, C // c_tile),
        in_specs=[pl.BlockSpec((b_tile, c_tile, hw_tile),
                               lambda n, h, c: (n, c, h))],
        out_specs=pl.BlockSpec((b_tile, 2, hw_tile),
                               lambda n, h, c: (n, 0, h)),
        scratch_shapes=[pltpu.VMEM((b_tile, ch_chunk, hw_tile), jnp.float32),
                        pltpu.VMEM((b_tile, ch_chunk, hw_tile), jnp.float32)],
        compiler_params=pltpu.CompilerParams(
            dimension_semantics=("parallel", "parallel", "arbitrary"),
            vmem_limit_bytes=vmem_limit),
    )(x3)

    feat = pooled.reshape(N, 2, H, W)   # free: contiguous reshape in HBM

    # ---- Pass 2: 7x7 conv (2 -> 1 channels) + sigmoid on tiny 2-ch maps ----
    pd_item = jnp.dtype(pool_dtype).itemsize
    b2_cap = max(1, block_budget // max(1, HW * (2 * pd_item + x.dtype.itemsize)))
    b_tile2 = _largest_divisor_leq(N, min(N, 32, b2_cap))

    out = pl.pallas_call(
        functools.partial(_conv_sigmoid_kernel, b_tile=b_tile2),
        out_shape=jax.ShapeDtypeStruct((N, 1, H, W), x.dtype),
        grid=(N // b_tile2,),
        in_specs=[pl.BlockSpec((b_tile2, 2, H, W), lambda n: (n, 0, 0, 0)),
                  pl.BlockSpec(memory_space=pltpu.MemorySpace.SMEM)],
        out_specs=pl.BlockSpec((b_tile2, 1, H, W), lambda n: (n, 0, 0, 0)),
        scratch_shapes=[pltpu.VMEM((2, H + 2 * PAD, W + 2 * PAD), jnp.float32)],
        compiler_params=pltpu.CompilerParams(
            dimension_semantics=("parallel",),
            vmem_limit_bytes=vmem_limit),
    )(feat, w_flat)
    return out


def _reference(x, w):
    avg = jnp.mean(x, axis=1, keepdims=True)
    mx = jnp.max(x, axis=1, keepdims=True)
    feat = jnp.concatenate([avg, mx], axis=1)
    y = lax.conv_general_dilated(
        feat, w, window_strides=(1, 1), padding=((PAD, PAD), (PAD, PAD)),
        dimension_numbers=("NCHW", "OIHW", "NCHW"))
    return jax.nn.sigmoid(y)


if __name__ == "__main__":
    key = jax.random.PRNGKey(0)
    kx, kw = jax.random.split(key)

    # Input consistent with nn.Conv2d(2, 1, 7, padding=3): any (N, C, H, W).
    x = jax.random.normal(kx, (2, 4, 16, 16), dtype=jnp.float32)
    # Deterministic synthetic conv weight, PyTorch shape (out=1, in=2, 7, 7).
    w = 0.1 * jax.random.normal(kw, (1, 2, K, K), dtype=jnp.float32)

    out = spatial_attention(x, w)
    out = jax.block_until_ready(out)

    ref = _reference(x, w)
    assert out.shape == (2, 1, 16, 16), out.shape
    if not bool(jnp.allclose(out, ref, atol=1e-5, rtol=1e-5)):
        raise AssertionError("Pallas SpatialAttention does not match reference")

    print("KERNEL_OK")
</pallas_src>

<mosaic_0001>
module attributes {stable_mosaic.version = 11 : i64} {
  func.func @_pool_kernel(%arg0: i32, %arg1: i32, %arg2: i32, %arg3: memref<2x4x128xf32, #tpu.memory_space<vmem>>, %arg4: memref<2x2x128xf32, #tpu.memory_space<vmem>>, %arg5: memref<2x4x128xf32, #tpu.memory_space<vmem>>, %arg6: memref<2x4x128xf32, #tpu.memory_space<vmem>>) attributes {dimension_semantics = [#tpu.dimension_semantics<parallel>, #tpu.dimension_semantics<parallel>, #tpu.dimension_semantics<arbitrary>], iteration_bounds = array<i64: 1, 2, 1>, scalar_prefetch = 0 : i64, scratch_operands = 2 : i64, tpu.core_type = #tpu.core_type<tc>, window_params = [{transform_indices = @transform_0, window_bounds = array<i64: 2, 4, 128>}, {transform_indices = @transform_1, window_bounds = array<i64: 2, 2, 128>}]} {
    %c0_i32 = arith.constant 0 : i32
    %0 = arith.cmpi eq, %arg2, %c0_i32 : i32
    %1 = arith.extui %0 : i1 to i32
    %c0_i32_0 = arith.constant 0 : i32
    %2 = arith.cmpi ne, %1, %c0_i32_0 : i32
    scf.if %2 {
      %cst = arith.constant 0.000000e+00 : f32
      %13 = vector.broadcast %cst : f32 to vector<2x4x128xf32>
      %c0_17 = arith.constant 0 : index
      %c0_18 = arith.constant 0 : index
      %c0_19 = arith.constant 0 : index
      %14 = vector.load %arg5[%c0_17, %c0_18, %c0_19] : memref<2x4x128xf32, #tpu.memory_space<vmem>>, vector<2x4x128xf32>
      tpu.vector_store %arg5[%c0_17, %c0_18, %c0_19], %13 {strides = array<i32>} : memref<2x4x128xf32, #tpu.memory_space<vmem>>, vector<2x4x128xf32>,
      %cst_20 = arith.constant 0xFF800000 : f32
      %15 = vector.broadcast %cst_20 : f32 to vector<2x4x128xf32>
      %c0_21 = arith.constant 0 : index
      %c0_22 = arith.constant 0 : index
      %c0_23 = arith.constant 0 : index
      %16 = vector.load %arg6[%c0_21, %c0_22, %c0_23] : memref<2x4x128xf32, #tpu.memory_space<vmem>>, vector<2x4x128xf32>
      tpu.vector_store %arg6[%c0_21, %c0_22, %c0_23], %15 {strides = array<i32>} : memref<2x4x128xf32, #tpu.memory_space<vmem>>, vector<2x4x128xf32>,
    } else {
    }
    %c0 = arith.constant 0 : index
    %c0_1 = arith.constant 0 : index
    %c0_2 = arith.constant 0 : index
    %3 = vector.load %arg3[%c0, %c0_1, %c0_2] : memref<2x4x128xf32, #tpu.memory_space<vmem>>, vector<2x4x128xf32>
    %c0_3 = arith.constant 0 : index
    %c0_4 = arith.constant 0 : index
    %c0_5 = arith.constant 0 : index
    %4 = vector.load %arg5[%c0_3, %c0_4, %c0_5] : memref<2x4x128xf32, #tpu.memory_space<vmem>>, vector<2x4x128xf32>
    %5 = arith.addf %4, %3 : vector<2x4x128xf32>
    %c0_6 = arith.constant 0 : index
    %c0_7 = arith.constant 0 : index
    %c0_8 = arith.constant 0 : index
    %6 = vector.load %arg5[%c0_6, %c0_7, %c0_8] : memref<2x4x128xf32, #tpu.memory_space<vmem>>, vector<2x4x128xf32>
    tpu.vector_store %arg5[%c0_6, %c0_7, %c0_8], %5 {strides = array<i32>} : memref<2x4x128xf32, #tpu.memory_space<vmem>>, vector<2x4x128xf32>,
    %c0_9 = arith.constant 0 : index
    %c0_10 = arith.constant 0 : index
    %c0_11 = arith.constant 0 : index
    %7 = vector.load %arg6[%c0_9, %c0_10, %c0_11] : memref<2x4x128xf32, #tpu.memory_space<vmem>>, vector<2x4x128xf32>
    %8 = arith.maximumf %7, %3 : vector<2x4x128xf32>
    %c0_12 = arith.constant 0 : index
    %c0_13 = arith.constant 0 : index
    %c0_14 = arith.constant 0 : index
    %9 = vector.load %arg6[%c0_12, %c0_13, %c0_14] : memref<2x4x128xf32, #tpu.memory_space<vmem>>, vector<2x4x128xf32>
    tpu.vector_store %arg6[%c0_12, %c0_13, %c0_14], %8 {strides = array<i32>} : memref<2x4x128xf32, #tpu.memory_space<vmem>>, vector<2x4x128xf32>,
    %c0_i32_15 = arith.constant 0 : i32
    %10 = arith.cmpi eq, %arg2, %c0_i32_15 : i32
    %11 = arith.extui %10 : i1 to i32
    %c0_i32_16 = arith.constant 0 : i32
    %12 = arith.cmpi ne, %11, %c0_i32_16 : i32
    scf.if %12 {
      %c0_17 = arith.constant 0 : index
      %c0_18 = arith.constant 0 : index
      %c0_19 = arith.constant 0 : index
      %13 = vector.load %arg5[%c0_17, %c0_18, %c0_19] : memref<2x4x128xf32, #tpu.memory_space<vmem>>, vector<2x4x128xf32>
      %cst = arith.constant dense<0.000000e+00> : vector<2x128xf32>
      %14 = vector.multi_reduction <add>, %13, %cst [1] : vector<2x4x128xf32> to vector<2x128xf32>
      %cst_20 = arith.constant 2.500000e-01 : f32
      %15 = vector.broadcast %cst_20 : f32 to vector<2x128xf32>
      %16 = arith.mulf %14, %15 : vector<2x128xf32>
      %c0_21 = arith.constant 0 : index
      %c0_22 = arith.constant 0 : index
      %c0_23 = arith.constant 0 : index
      %17 = vector.load %arg4[%c0_21, %c0_22, %c0_23] : memref<2x2x128xf32, #tpu.memory_space<vmem>>, vector<2x1x128xf32>
      %18 = vector.shape_cast %17 : vector<2x1x128xf32> to vector<2x128xf32>
      %19 = vector.shape_cast %16 : vector<2x128xf32> to vector<2x1x128xf32>
      tpu.vector_store %arg4[%c0_21, %c0_22, %c0_23], %19 {strides = array<i32>} : memref<2x2x128xf32, #tpu.memory_space<vmem>>, vector<2x1x128xf32>,
      %c0_24 = arith.constant 0 : index
      %c0_25 = arith.constant 0 : index
      %c0_26 = arith.constant 0 : index
      %20 = vector.load %arg6[%c0_24, %c0_25, %c0_26] : memref<2x4x128xf32, #tpu.memory_space<vmem>>, vector<2x4x128xf32>
      %cst_27 = arith.constant dense<0xFF800000> : vector<2x128xf32>
      %21 = vector.multi_reduction <maximumf>, %20, %cst_27 [1] : vector<2x4x128xf32> to vector<2x128xf32>
      %c0_28 = arith.constant 0 : index
      %c1 = arith.constant 1 : index
      %c0_29 = arith.constant 0 : index
      %22 = vector.load %arg4[%c0_28, %c1, %c0_29] : memref<2x2x128xf32, #tpu.memory_space<vmem>>, vector<2x1x128xf32>
      %23 = vector.shape_cast %22 : vector<2x1x128xf32> to vector<2x128xf32>
      %24 = vector.shape_cast %21 : vector<2x128xf32> to vector<2x1x128xf32>
      tpu.vector_store %arg4[%c0_28, %c1, %c0_29], %24 {strides = array<i32>} : memref<2x2x128xf32, #tpu.memory_space<vmem>>, vector<2x1x128xf32>,
    } else {
    }
    return
  }
  func.func @transform_0(%arg0: i32, %arg1: i32, %arg2: i32) -> (i32, i32, i32) {
    %c0_i32 = arith.constant 0 : i32
    return %arg0, %arg2, %arg1 : i32, i32, i32
  }
  func.func @transform_1(%arg0: i32, %arg1: i32, %arg2: i32) -> (i32, i32, i32) {
    %c0_i32 = arith.constant 0 : i32
    %c0_i32_0 = arith.constant 0 : i32
    return %arg0, %c0_i32, %arg1 : i32, i32, i32
  }
}

</mosaic_0001>

<bundles_post_ra>
// kernel: tpu_custom_call.1
= control target key start
LH: loop header
LB: loop body
LE: loop exit
PB: predicated region body
PF: predicated region fallthrough
CT: control target
= control target key end

     0   :  { %6 = vsyncpa [#allocation5], 0  ;;  %s727_s0 = inlined_call_operand.hbm [shape: f32[2,4,256], index: 0, kind: input, shape index: {}]   ;;  %s728_s1 = inlined_call_operand.hbm [shape: f32[2,2,256], index: 1, kind: output, shape index: {}]  }
   0x1   :  { %8 = vsyncpa [#allocation5 + $0x1], 0 }
   0x2   :  { %9 = vsyncpa [#allocation6], 0 }
   0x3   :  { %11 = vsyncpa [#allocation6 + $0x1], 0  ;;  %s553_s6 = smov 0   ;;  %s555_s7 = smov 0  }
   0x4   :  { %s557_s8 = smov 0   ;;  %s559_s9 = smov 0  }
   0x5   :  { %s561_s10 = smov 0   ;;  %s563_s11 = smov 0  }
   0x6 LB: > { %s336_s12 = sadd.s32 4294967295, %s531_s11   ;;  %s337_s13 = sadd.s32 4294967294, %s531_s11   ;;  %s531_s11 = sphi %s563_s11, %s17_s11   ;;  %s527_s10 = sphi %s561_s10, %s742_s10   ;;  %s523_s9 = sphi %s559_s9, %s741_s9   ;;  %s519_s8 = sphi %s557_s8, %s740_s8   ;;  %s515_s7 = sphi %s555_s7, %s739_s7   ;;  %s511_s6 = sphi %s553_s6, %s738_s6  }
   0x7   : > { %s32_s14 = sadd.s32 1, %s527_s10  ;;  %s47_s15 = sadd.s32 1, %s519_s8 }
   0x8   : > { %p34_p0 = scmp.ge.s32.totalorder %s32_s14, 2  ;;  %p54_p1 = scmp.ne.s32.totalorder %s519_s8, %s515_s7 }
   0x9   : > { %p55_p2 = scmp.eq.s32.totalorder %s531_s11, 0  ;;  %p60_p3 = scmp.ne.s32.totalorder %s515_s7, %s511_s6 }
   0xa   : > { %s744_s14 = smov (%p34_p0, %s32_s14), 0  ;;  %p61_p5 = scmp.eq.s32.totalorder %s336_s12, 0 }
   0xb   : > { %p594_p4 = por %p55_p2, %p54_p1  ;;  %s43_s17 = ssub.s32 %s527_s10, %s744_s14 }
   0xc   : > { %p86_p6 = scmp.eq.s32.totalorder %s336_s12, 1  ;;  %p45_p7 = scmp.eq.s32.totalorder %s43_s17, 0 }
   0xd   : > { %p600_p8 = por %p61_p5, %p60_p3  ;;  %p92_p10 = scmp.eq.s32.totalorder %s337_s13, 1 }
   0xe   : > { %p604_p9 = por %p86_p6, %p54_p1  ;;  %p361_p13 = scmp.lt.s32.totalorder %s531_s11, 2 }
   0xf   : > { %s609_s20 = scalar_select %p45_p7, %s519_s8, %s47_s15  }
  0x10   : > { %s732_s19 = scalar_select %p604_p9, 1, 0 }
  0x11   : > { %p611_p11 = por %p92_p10, %p60_p3  ;;  %s112_s22 = sand.u32 1, %s519_s8  }
  0x12   : > { %s340_s23 = sshll.u32 %s112_s22, 3  ;;  %s341_s24 = sshll.u32 %s527_s10, 6 }
  0x13   : > { %s733_s21 = scalar_select %p611_p11, 1, 0 }
  0x14   : > { %s622_s27 = scalar_lea.hbm %s727_s0, %s341_s24  ;;  %s116_s28 = scalar_lea.vmem [#allocation4], %s340_s23 }
  0x15   : > { %s127_s29 = sshll.u32 %s116_s28, 4  ;;  %p628_p0 = pnand %p361_p13, %p594_p4  ;;  %s624_s29 = int_to_ptr.vmem [resolvable:$true] %s127_s29 }
  0x16   : > { %s632_s2 = scalar_lea.sflag [#allocation5], %s112_s22  ;;  %s419_s3 = scalar_lea.hbm %s622_s27, 128 }
  0x17   : > { %p420_p1 = scmp.ne.s32.totalorder %s622_s27, %s419_s3  ;;  %p421_p2 = pneg %p628_p0 }
  0x18   : > { %s424_s12 = scalar_lea.hbm %s727_s0, 256  ;;  %p425_p4 = scmp.lt.u32.totalorder %s622_s27, %s727_s0 }
  0x19   : > { %p422_p3 = pnand %p421_p2, %p420_p1  ;;  %p426_p6 = scmp.lt.u32.totalorder %s424_s12, %s419_s3 }
  0x1a   : > { %p428_p10 = scmp.lt.u32.totalorder %s419_s3, %s622_s27 }
  0x1b   : > { %p423_p5 = pneg %p422_p3  ;;  %p427_p7 = por %p426_p6, %p425_p4 }
  0x1d   : > { %p429_p13 = por %p428_p10, %p427_p7 }
  0x1f   : > { %p430_p12 = pnand %p429_p13, %p423_p5 }
  0x21   : > { %433 = shalt.err (!%p430_p12)
}
  0x22   : > { %s434_s16 = scalar_lea.vmem %s624_s29, 128  ;;  %s533_s17 = smov [#allocation4]  }
  0x23   : > { %p435_p1 = scmp.ne.s32.totalorder %s624_s29, %s434_s16  ;;  %s439_s22 = sshll.u32 %s533_s17, 4  ;;  %s440_s22 = int_to_ptr.vmem [resolvable:$false] %s439_s22 }
  0x24   : > { %s441_s23 = scalar_lea.vmem %s440_s22, 256  ;;  %p442_p9 = scmp.lt.s32.totalorder %s624_s29, %s440_s22 }
  0x25   : > { %p437_p3 = pnand %p435_p1, %p421_p2  ;;  %p443_p4 = scmp.lt.s32.totalorder %s441_s23, %s434_s16 }
  0x27   : > { %p438_p11 = pneg %p437_p3  ;;  %p444_p6 = por %p443_p4, %p442_p9 }
  0x29   : > { %p445_p7 = pnand %p444_p6, %p438_p11 }
  0x2b   : > { %448 = shalt.err (!%p445_p7)
}
  0x2c   : > { %s534_s24 = smov 128   ;;  %s535_s25 = smov 64  }
  0x2d   : > { %s536_s26 = smov 4   ;;  %p342_p12 = scmp.ge.s32.totalorder %s531_s11, 1 }
  0x2e   : > { %356 = dma.hbm_to_vmem [thread:$0]  (!%p628_p0), %s622_s27, 128, %s624_s29, %s632_s2, %s534_s24, %s535_s25, %s536_s26  }
  0x2f   : > { %p135_p2 = scmp.lt.s32.totalorder %s531_s11, 3 }
  0x31   : > { %p136_p5 = pnand %p342_p12, %p135_p2 }
  0x32   : > { %s663_s28 = sand.u32 (!%p136_p5), 1, %s515_s7  }
  0x33   : > { %139 = sbr.rel (%p136_p5) target bundleno = 109 (0x6d), region = 24  ;;  %s343_s3 = sshll.u32 (!%p136_p5), %s663_s28, 3 }
  0x34   : > { %s142_s4 = scalar_lea.sflag (!%p136_p5), [#allocation5], %s663_s28  ;;  %s145_s5 = scalar_lea.vmem (!%p136_p5), [#allocation4], %s343_s3 }
  0x3a   : > { %502 = dma.done.wait (%p600_p8), %s142_s4, 128  }
  0x3b   : > { %504 = vsyncadd (%p600_p8), %s142_s4, 4294967168  ;;  %v537_v0 = vmov 0.0   ;;  %v538_v1 = vmov -inf   ;;  %v174_v2 = vld [vmem:[%s145_s5] sm:$0xf]  ;;  %vm193_vm0 = vcmask 1043456  }
  0x3c   : > { %170 = vst [vmem:[#allocation2] sm:$0xf] %v537_v0  ;;  %171 = vst [vmem:[#allocation2 + $0x4] sm:$0xf] %v537_v0  ;;  %v175_v3 = vld [vmem:[%s145_s5 + $0x4] sm:$0xf] }
  0x3d   : > { %172 = vst [vmem:[#allocation3] sm:$0xf] %v538_v1  ;;  %173 = vst [vmem:[#allocation3 + $0x4] sm:$0xf] %v538_v1  ;;  %s344_s18 = sshll.u32 %s663_s28, 2  ;;  %s346_s27 = sshll.u32 %s523_s9, 5 }
  0x3e   : > { %s163_s29 = scalar_lea.vmem [#allocation7], %s344_s18  ;;  %s676_s13 = scalar_lea.hbm %s728_s1, %s346_s27 }
  0x3f   : > { %s246_s30 = sshll.u32 %s163_s29, 4  ;;  %s231_s9 = scalar_lea.sflag [#allocation6], %s663_s28  ;;  %s678_s30 = int_to_ptr.vmem [resolvable:$true] %s246_s30 }
  0x40   : > { %s449_s15 = scalar_lea.vmem %s678_s30, 64  ;;  %p735_p9 = scmp.ne.s32.totalorder %s732_s19, 0 }
  0x41   : > { %p450_p8 = scmp.ne.s32.totalorder %s678_s30, %s449_s15  ;;  %s539_s16 = smov [#allocation7]  }
  0x42   : > { %s453_s17 = sshll.u32 %s539_s16, 4  ;;  %s454_s17 = int_to_ptr.vmem [resolvable:$false] %s453_s17 }
  0x43   : > { %v176_v4 = vld [vmem:[#allocation2] sm:$0xf]  ;;  %v177_v5 = vld [vmem:[#allocation2 + $0x4] sm:$0xf]  ;;  %p451_p11 = pnand %p450_p8, %p735_p9  ;;  %s455_s22 = scalar_lea.vmem %s454_s17, 128 }
  0x44   : > { %v182_v6 = vld [vmem:[#allocation3] sm:$0xf]  ;;  %v178_v7 = vadd.f32 %v176_v4, %v174_v2  ;;  %v179_v8 = vadd.f32 %v177_v5, %v175_v3  ;;  %v183_v10 = vld [vmem:[#allocation3 + $0x4] sm:$0xf]  ;;  %p456_p10 = scmp.lt.s32.totalorder %s678_s30, %s454_s17  ;;  %p457_p13 = scmp.lt.s32.totalorder %s455_s22, %s449_s15 }
  0x45   : > { %v184_v9 = vmax.f32 %v182_v6, %v174_v2  ;;  %v185_v11 = vmax.f32 %v183_v10, %v175_v3  ;;  %p452_p0 = pneg %p451_p11 }
  0x46   : > { %180 = vst [vmem:[#allocation2] sm:$0xf] %v178_v7  ;;  %181 = vst [vmem:[#allocation2 + $0x4] sm:$0xf] %v179_v8  ;;  %p458_p1 = por %p457_p13, %p456_p10 }
  0x47   : > { %186 = vst [vmem:[#allocation3] sm:$0xf] %v184_v9  ;;  %187 = vst [vmem:[#allocation3 + $0x4] sm:$0xf] %v185_v11 }
  0x48   : > { %p459_p3 = pnand %p458_p1, %p452_p0 }
  0x4d   : > { %v191_v13 = vld [vmem:[#allocation2] sm:$0xf]  ;;  %v192_v14 = vld [vmem:[#allocation2 + $0x4] sm:$0xf] }
  0x4e   : > { %v212_v12 = vld [vmem:[#allocation3] sm:$0xf]  ;;  %v213_v16 = vld [vmem:[#allocation3 + $0x4] sm:$0xf]  ;;  %v194_v17 = vsel %vm193_vm0, %v191_v13, 0.0  ;;  %v201_v18 = vsel %vm193_vm0, %v192_v14, 0.0 }
  0x4f   : > { %v214_v15 = vsel %vm193_vm0, %v212_v12, -inf  ;;  %v221_v20 = vsel %vm193_vm0, %v213_v16, -inf  ;;  %v195_v21 = vrot.slane %v194_v17, 4  ;;  %v202_v22 = vrot.slane %v201_v18, 4 }
  0x50   : > { %v215_v19 = vrot.slane %v214_v15, 4  ;;  %v222_v23 = vrot.slane %v221_v20, 4 }
  0x51   : > { %v196_v25 = vadd.f32 %v195_v21, %v194_v17  ;;  %v203_v26 = vadd.f32 %v202_v22, %v201_v18 }
  0x52   : > { %v216_v24 = vmax.f32 %v214_v15, %v215_v19  ;;  %v223_v27 = vmax.f32 %v221_v20, %v222_v23 }
  0x53   : > { %v197_v29 = vrot.slane %v196_v25, 2  ;;  %v204_v30 = vrot.slane %v203_v26, 2 }
  0x54   : > { %v217_v28 = vrot.slane %v216_v24, 2  ;;  %v224_v31 = vrot.slane %v223_v27, 2 }
  0x55   : > { %v198_v33 = vadd.f32 %v197_v29, %v196_v25  ;;  %v205_v34 = vadd.f32 %v204_v30, %v203_v26 }
  0x56   : > { %v218_v32 = vmax.f32 %v216_v24, %v217_v28  ;;  %v225_v35 = vmax.f32 %v223_v27, %v224_v31 }
  0x57   : > { %v199_v37 = vrot.slane %v198_v33, 1  ;;  %v206_v38 = vrot.slane %v205_v34, 1 }
  0x58   : > { %v219_v36 = vrot.slane %v218_v32, 1  ;;  %v226_v39 = vrot.slane %v225_v35, 1 }
  0x59   : > { %v200_v41 = vadd.f32 %v199_v37, %v198_v33  ;;  %v207_v42 = vadd.f32 %v206_v38, %v205_v34 }
  0x5a   : > { %v220_v40 = vmax.f32 %v218_v32, %v219_v36  ;;  %v227_v43 = vmax.f32 %v225_v35, %v226_v39 }
  0x5b   : > { %v208_v44 = vmul.f32 0.25, %v200_v41  ;;  %v209_v45 = vmul.f32 0.25, %v207_v42 }
  0x5c   : > { %228 = vst [vmem:[%s163_s29 + $0x1] sm:$0x1] %v220_v40  ;;  %229 = vst [vmem:[%s163_s29 + $0x3] sm:$0x1] %v227_v43 }
  0x5d   : > { %210 = vst [vmem:[%s163_s29] sm:$0x1] %v208_v44  ;;  %211 = vst [vmem:[%s163_s29 + $0x2] sm:$0x1] %v209_v45 }
  0x5e   : > { %462 = shalt.err (!%p459_p3)
}
  0x5f   : > { %s463_s23 = scalar_lea.hbm %s676_s13, 64  ;;  %s467_s26 = scalar_lea.hbm %s728_s1, 128 }
  0x60   : > { %p464_p4 = scmp.ne.s32.totalorder %s676_s13, %s463_s23  ;;  %p468_p12 = scmp.lt.u32.totalorder %s676_s13, %s728_s1 }
  0x61   : > { %p469_p2 = scmp.lt.u32.totalorder %s467_s26, %s463_s23  ;;  %p471_p8 = scmp.lt.u32.totalorder %s463_s23, %s676_s13 }
  0x62   : > { %p465_p6 = pnand %p464_p4, %p735_p9 }
  0x63   : > { %p470_p5 = por %p469_p2, %p468_p12 }
  0x64   : > { %p466_p7 = pneg %p465_p6 }
  0x65   : > { %p472_p11 = por %p471_p8, %p470_p5 }
  0x67   : > { %p473_p0 = pnand %p472_p11, %p466_p7 }
  0x69   : > { %476 = shalt.err (!%p473_p0)
}
  0x6a   : > { %s540_s5 = smov 32   ;;  %s541_s18 = smov 64  }
  0x6b   : > { %s542_s27 = smov 2  }
  0x6c   : > { %351 = dma.vmem_to_hbm [thread:$0]  (%p735_p9), %s678_s30, 64, %s676_s13, %s231_s9, %s540_s5, %s541_s18, %s542_s27  }
  0x6d PF: > { %s261_s29 = sand.u32 1, %s511_s6   ;;  %p736_p10 = scmp.ne.s32.totalorder %s733_s21, 0 }
  0x6e   : > { %p737_p13 = scmp.ge.s32.totalorder %s531_s11, 2  ;;  %s262_s2 = scalar_lea.sflag [#allocation6], %s261_s29 }
  0x70   : > { %p358_p1 = pnand %p737_p13, %p736_p10 }
  0x72   : > { %506 = dma.done.wait (!%p358_p1), %s262_s2, 64  }
  0x73   : > { %508 = vsyncadd (!%p358_p1), %s262_s2, 4294967232  ;;  %s17_s11 = sadd.s32 1, %s531_s11   ;;  %s738_s6 = smov %s515_s7 }
  0x74   : > { %p14_p3 = scmp.ge.s32.totalorder %s17_s11, 4   ;;  %s739_s7 = smov %s519_s8 }
  0x75   : > { %s740_s8 = smov %s609_s20  ;;  %s741_s9 = smov %s527_s10 }
  0x76   : > { %s742_s10 = smov %s744_s14  ;;  %16 = sbr.rel (!%p14_p3) target bundleno = 6 (0x6), region = 77 }
  0x7d   :  { %267 = vsyncpa [#allocation5], 1 }
  0x7e   :  { %269 = vsyncpa [#allocation5 + $0x1], 1 }
  0x7f   :  { %270 = vsyncpa [#allocation6], 1 }
  0x80   :  { %272 = vsyncpa [#allocation6 + $0x1], 1 }

</bundles_post_ra>
